<compile_context>
chip_gen: v7x
topology: tpu7x:2x2x1
jax: 0.10.0
libtpu: 0.0.40
codegen_flags: <defaults>
</compile_context>

<pallas_src>
import functools
import math

import jax
import jax.numpy as jnp
from jax import lax
from jax.experimental import pallas as pl
from jax.experimental.pallas import tpu as pltpu


DEFAULT_TILE_TOKENS = 256       # tokens per grid step (multiple of 8)
ROWS_PER_GROUP = 8              # rows assembled per dense (8, D) store

# Conservative bound for keeping the whole table VMEM-resident (~40% of v7x's
# 64 MiB per-core VMEM; leaves plenty of headroom on v5e/v6e).
_RESIDENT_TABLE_LIMIT_BYTES = 24 << 20


def _round_up(x, m):
    return ((x + m - 1) // m) * m


def _embedding_kernel(ids_smem, table_ref, o_ref, *, scale, tile, vocab_size):
    """Gather `tile` rows of the VMEM-resident table, scale, store densely."""
    base = pl.program_id(0) * tile
    n_groups = tile // ROWS_PER_GROUP

    def gather_group(g, carry):
        off = pl.multiple_of(g * ROWS_PER_GROUP, ROWS_PER_GROUP)
        rows = []
        for r in range(ROWS_PER_GROUP):                 # small fixed unroll only
            tok = ids_smem[base + off + r]
            # Dynamic VMEM loads have no bounds check -> clamp untrusted ids.
            tok = jnp.clip(tok, 0, vocab_size - 1)
            rows.append(table_ref[pl.ds(tok, 1), :])
        block = jnp.concatenate(rows, axis=0)           # (8, D) dense block
        block = block.astype(jnp.float32) * scale       # one block-wide scale
        o_ref[pl.ds(off, ROWS_PER_GROUP), :] = block.astype(o_ref.dtype)
        return carry

    lax.fori_loop(0, n_groups, gather_group, 0)


def input_embedding(ids, table, *, tile_tokens=DEFAULT_TILE_TOKENS):
    """ids: (B, S) int token ids; table: (V, D).

    Returns (B, S, D) = table[ids] * sqrt(D)  (torch InputEmbedding forward).
    """
    B, S = ids.shape
    V, D = table.shape
    N = B * S

    table_bytes = V * D * table.dtype.itemsize
    if table_bytes > _RESIDENT_TABLE_LIMIT_BYTES:
        # TODO(synk): for tables too large for per-core VMEM (realistic
        # vocab x d_model), keep the table in HBM (memory_space=pl.ANY) and
        # gather rows with double-buffered pltpu.make_async_copy DMAs.
        raise NotImplementedError("embedding table too large to keep VMEM-resident")

    # Token tile per grid step: as large as reasonable, multiple of 8.
    tile = min(_round_up(tile_tokens, ROWS_PER_GROUP), _round_up(N, ROWS_PER_GROUP))
    n_pad = _round_up(N, tile)
    grid = n_pad // tile

    # TODO(synk): for very long sequences (B*S >> ~100K tokens) the flat id
    # vector overflows SMEM; stream per-tile id blocks instead of prefetching.
    ids_flat = ids.reshape(N).astype(jnp.int32)
    if n_pad != N:
        ids_flat = jnp.pad(ids_flat, (0, n_pad - N))    # padded ids point at row 0

    out_rows = n_pad  # == N in the common (divisible) case -> no slice copy below
    out_itemsize = table.dtype.itemsize
    vmem_limit = max(
        16 << 20,
        int(table_bytes + 2 * tile * D * out_itemsize + (4 << 20)),
    )

    kernel = functools.partial(
        _embedding_kernel, scale=math.sqrt(D), tile=tile, vocab_size=V
    )

    out = pl.pallas_call(
        kernel,
        grid_spec=pltpu.PrefetchScalarGridSpec(
            num_scalar_prefetch=1,                 # ids land in SMEM before the grid
            grid=(grid,),
            in_specs=[
                # Whole table resident in VMEM; constant block index => fetched
                # from HBM once for the whole grid; single-buffered to halve its
                # VMEM footprint (important on v7x's 64 MiB per-core VMEM).
                pl.BlockSpec((V, D), lambda i, ids: (0, 0),
                             pipeline_mode=pl.Buffered(1)),
            ],
            out_specs=pl.BlockSpec((tile, D), lambda i, ids: (i, 0)),
        ),
        out_shape=jax.ShapeDtypeStruct((out_rows, D), table.dtype),
        compiler_params=pltpu.CompilerParams(
            dimension_semantics=("parallel",),     # independent token tiles (megacore)
            vmem_limit_bytes=vmem_limit,
        ),
        cost_estimate=pl.CostEstimate(
            flops=N * D,
            transcendentals=0,
            bytes_accessed=N * D * out_itemsize + table_bytes + N * 4,
        ),
    )(ids_flat, table)

    if out_rows != N:
        out = out[:N]
    return out.reshape(B, S, D)


def reference(ids, table):
    return table[ids] * math.sqrt(table.shape[1])


if __name__ == "__main__":
    d_model = 32
    vocab_size = 1000
    B, S = 2, 8

    key = jax.random.PRNGKey(0)
    k_ids, k_tbl = jax.random.split(key)

    ids = jax.random.randint(k_ids, (B, S), 0, vocab_size, dtype=jnp.int32)
    table = jax.random.normal(k_tbl, (vocab_size, d_model), jnp.float32)

    out = jax.block_until_ready(input_embedding(ids, table))

    ref = reference(ids, table)
    assert out.shape == (B, S, d_model)
    assert out.dtype == jnp.float32
    assert jnp.allclose(out, ref, atol=1e-6, rtol=1e-6), "mismatch vs reference"

    print("KERNEL_OK")
</pallas_src>

<mosaic_0001>
module attributes {stable_mosaic.version = 11 : i64} {
  func.func @_embedding_kernel(%arg0: i32, %arg1: memref<16xi32, #tpu.memory_space<smem>>, %arg2: memref<1000x32xf32, #tpu.memory_space<vmem>>, %arg3: memref<16x32xf32, #tpu.memory_space<vmem>>) attributes {dimension_semantics = [#tpu.dimension_semantics<parallel>], iteration_bounds = array<i64: 1>, scalar_prefetch = 1 : i64, scratch_operands = 0 : i64, tpu.core_type = #tpu.core_type<tc>, window_params = [{pipeline_mode = #tpu.pipeline_mode<synchronous>, transform_indices = @transform_0, window_bounds = array<i64: 1000, 32>}, {transform_indices = @transform_1, window_bounds = array<i64: 16, 32>}]} {
    %c16_i32 = arith.constant 16 : i32
    %0 = arith.muli %arg0, %c16_i32 : i32
    %c0_i32 = arith.constant 0 : i32
    %c2_i32 = arith.constant 2 : i32
    %1 = arith.addi %c0_i32, %c2_i32 : i32
    %c1_i32 = arith.constant 1 : i32
    scf.for %arg4 = %c0_i32 to %1 step %c1_i32  : i32 {
      %c8_i32 = arith.constant 8 : i32
      %2 = arith.muli %arg4, %c8_i32 : i32
      %3 = tpu.assume_multiple %2, 8 : i32
      %4 = arith.addi %0, %3 : i32
      %c0_i32_1 = arith.constant 0 : i32
      %5 = arith.addi %4, %c0_i32_1 : i32
      %6 = arith.index_cast %5 : i32 to index
      %7 = memref.load %arg1[%6] : memref<16xi32, #tpu.memory_space<smem>>
      %c0_i32_2 = arith.constant 0 : i32
      %c999_i32 = arith.constant 999 : i32
      %8 = arith.maxsi %c0_i32_2, %7 : i32
      %9 = arith.minsi %c999_i32, %8 : i32
      %10 = arith.index_cast %9 : i32 to index
      %c0 = arith.constant 0 : index
      %11 = vector.load %arg2[%10, %c0] : memref<1000x32xf32, #tpu.memory_space<vmem>>, vector<1x32xf32>
      %12 = arith.addi %0, %3 : i32
      %c1_i32_3 = arith.constant 1 : i32
      %13 = arith.addi %12, %c1_i32_3 : i32
      %14 = arith.index_cast %13 : i32 to index
      %15 = memref.load %arg1[%14] : memref<16xi32, #tpu.memory_space<smem>>
      %c0_i32_4 = arith.constant 0 : i32
      %c999_i32_5 = arith.constant 999 : i32
      %16 = arith.maxsi %c0_i32_4, %15 : i32
      %17 = arith.minsi %c999_i32_5, %16 : i32
      %18 = arith.index_cast %17 : i32 to index
      %c0_6 = arith.constant 0 : index
      %19 = vector.load %arg2[%18, %c0_6] : memref<1000x32xf32, #tpu.memory_space<vmem>>, vector<1x32xf32>
      %20 = arith.addi %0, %3 : i32
      %c2_i32_7 = arith.constant 2 : i32
      %21 = arith.addi %20, %c2_i32_7 : i32
      %22 = arith.index_cast %21 : i32 to index
      %23 = memref.load %arg1[%22] : memref<16xi32, #tpu.memory_space<smem>>
      %c0_i32_8 = arith.constant 0 : i32
      %c999_i32_9 = arith.constant 999 : i32
      %24 = arith.maxsi %c0_i32_8, %23 : i32
      %25 = arith.minsi %c999_i32_9, %24 : i32
      %26 = arith.index_cast %25 : i32 to index
      %c0_10 = arith.constant 0 : index
      %27 = vector.load %arg2[%26, %c0_10] : memref<1000x32xf32, #tpu.memory_space<vmem>>, vector<1x32xf32>
      %28 = arith.addi %0, %3 : i32
      %c3_i32 = arith.constant 3 : i32
      %29 = arith.addi %28, %c3_i32 : i32
      %30 = arith.index_cast %29 : i32 to index
      %31 = memref.load %arg1[%30] : memref<16xi32, #tpu.memory_space<smem>>
      %c0_i32_11 = arith.constant 0 : i32
      %c999_i32_12 = arith.constant 999 : i32
      %32 = arith.maxsi %c0_i32_11, %31 : i32
      %33 = arith.minsi %c999_i32_12, %32 : i32
      %34 = arith.index_cast %33 : i32 to index
      %c0_13 = arith.constant 0 : index
      %35 = vector.load %arg2[%34, %c0_13] : memref<1000x32xf32, #tpu.memory_space<vmem>>, vector<1x32xf32>
      %36 = arith.addi %0, %3 : i32
      %c4_i32 = arith.constant 4 : i32
      %37 = arith.addi %36, %c4_i32 : i32
      %38 = arith.index_cast %37 : i32 to index
      %39 = memref.load %arg1[%38] : memref<16xi32, #tpu.memory_space<smem>>
      %c0_i32_14 = arith.constant 0 : i32
      %c999_i32_15 = arith.constant 999 : i32
      %40 = arith.maxsi %c0_i32_14, %39 : i32
      %41 = arith.minsi %c999_i32_15, %40 : i32
      %42 = arith.index_cast %41 : i32 to index
      %c0_16 = arith.constant 0 : index
      %43 = vector.load %arg2[%42, %c0_16] : memref<1000x32xf32, #tpu.memory_space<vmem>>, vector<1x32xf32>
      %44 = arith.addi %0, %3 : i32
      %c5_i32 = arith.constant 5 : i32
      %45 = arith.addi %44, %c5_i32 : i32
      %46 = arith.index_cast %45 : i32 to index
      %47 = memref.load %arg1[%46] : memref<16xi32, #tpu.memory_space<smem>>
      %c0_i32_17 = arith.constant 0 : i32
      %c999_i32_18 = arith.constant 999 : i32
      %48 = arith.maxsi %c0_i32_17, %47 : i32
      %49 = arith.minsi %c999_i32_18, %48 : i32
      %50 = arith.index_cast %49 : i32 to index
      %c0_19 = arith.constant 0 : index
      %51 = vector.load %arg2[%50, %c0_19] : memref<1000x32xf32, #tpu.memory_space<vmem>>, vector<1x32xf32>
      %52 = arith.addi %0, %3 : i32
      %c6_i32 = arith.constant 6 : i32
      %53 = arith.addi %52, %c6_i32 : i32
      %54 = arith.index_cast %53 : i32 to index
      %55 = memref.load %arg1[%54] : memref<16xi32, #tpu.memory_space<smem>>
      %c0_i32_20 = arith.constant 0 : i32
      %c999_i32_21 = arith.constant 999 : i32
      %56 = arith.maxsi %c0_i32_20, %55 : i32
      %57 = arith.minsi %c999_i32_21, %56 : i32
      %58 = arith.index_cast %57 : i32 to index
      %c0_22 = arith.constant 0 : index
      %59 = vector.load %arg2[%58, %c0_22] : memref<1000x32xf32, #tpu.memory_space<vmem>>, vector<1x32xf32>
      %60 = arith.addi %0, %3 : i32
      %c7_i32 = arith.constant 7 : i32
      %61 = arith.addi %60, %c7_i32 : i32
      %62 = arith.index_cast %61 : i32 to index
      %63 = memref.load %arg1[%62] : memref<16xi32, #tpu.memory_space<smem>>
      %c0_i32_23 = arith.constant 0 : i32
      %c999_i32_24 = arith.constant 999 : i32
      %64 = arith.maxsi %c0_i32_23, %63 : i32
      %65 = arith.minsi %c999_i32_24, %64 : i32
      %66 = arith.index_cast %65 : i32 to index
      %c0_25 = arith.constant 0 : index
      %67 = vector.load %arg2[%66, %c0_25] : memref<1000x32xf32, #tpu.memory_space<vmem>>, vector<1x32xf32>
      %68 = tpu.concatenate %11, %19, %27, %35, %43, %51, %59, %67 in 0 : vector<1x32xf32>, vector<1x32xf32>, vector<1x32xf32>, vector<1x32xf32>, vector<1x32xf32>, vector<1x32xf32>, vector<1x32xf32>, vector<1x32xf32> -> vector<8x32xf32>
      %cst = arith.constant 5.65685415 : f32
      %69 = vector.broadcast %cst : f32 to vector<8x32xf32>
      %70 = arith.mulf %68, %69 : vector<8x32xf32>
      %71 = arith.index_cast %3 : i32 to index
      %c0_26 = arith.constant 0 : index
      %72 = vector.load %arg3[%71, %c0_26] : memref<16x32xf32, #tpu.memory_space<vmem>>, vector<8x32xf32>
      tpu.vector_store %arg3[%71, %c0_26], %70 {strides = array<i32>} : memref<16x32xf32, #tpu.memory_space<vmem>>, vector<8x32xf32>,
    }
    %c2_i32_0 = arith.constant 2 : i32
    return
  }
  func.func @transform_0(%arg0: i32, %arg1: memref<16xi32, #tpu.memory_space<smem>>) -> (i32, i32) {
    %c0_i32 = arith.constant 0 : i32
    %c0_i32_0 = arith.constant 0 : i32
    %c0_i32_1 = arith.constant 0 : i32
    return %c0_i32, %c0_i32_0 : i32, i32
  }
  func.func @transform_1(%arg0: i32, %arg1: memref<16xi32, #tpu.memory_space<smem>>) -> (i32, i32) {
    %c0_i32 = arith.constant 0 : i32
    %c0_i32_0 = arith.constant 0 : i32
    return %arg0, %c0_i32 : i32, i32
  }
}

</mosaic_0001>

<bundles_post_ra>
// kernel: tpu_custom_call.1
= control target key start
LH: loop header
LB: loop body
LE: loop exit
PB: predicated region body
PF: predicated region fallthrough
CT: control target
= control target key end

     0   :  { %s363_s0 = inlined_call_operand.vmem [shape: s32[16], index: 0, kind: input, shape index: {}]   ;;  %s364_s1 = inlined_call_operand.vmem [shape: f32[1000,32], index: 1, kind: input, shape index: {}]   ;;  %s365_s2 = inlined_call_operand.hbm [shape: f32[16,32], index: 2, kind: output, shape index: {}]  }
   0x1   :  { %s7_s11 = sshll.u32 %s363_s0, 4  ;;  %s8_s11 = int_to_ptr.vmem [resolvable:$true] %s7_s11 }
   0x2   :  { %s227_s12 = scalar_lea.vmem %s8_s11, 16  ;;  %p232_p1 = scmp.lt.s32.totalorder %s8_s11, %s8_s11 }
   0x3   :  { %p228_p0 = scmp.ne.s32.totalorder %s8_s11, %s227_s12  ;;  %p233_p2 = scmp.lt.s32.totalorder %s227_s12, %s227_s12 }
   0x5   :  { %p234_p3 = por %p233_p2, %p232_p1 }
   0x7   :  { %p235_p4 = pnand %p234_p3, %p228_p0 }
   0x9   :  { %238 = shalt.err (!%p235_p4)  }
   0xa   :  { %s273_s13 = smov [#allocation3]  }
   0xb   :  { %10 = dma.vmem_to_smem %s8_s11, 16, %s273_s13, [#allocation2] }
   0xc   :  { %265 = dma.done.wait [#allocation2], 16 }
   0xd   :  { %266 = vsyncadd [#allocation2], 4294967280 }
   0xe   :  { %12 = sfence }
   0xf   :  { %13 = vsyncpa [#allocation5], 0  ;;  %s295_s14 = smov 0  }
  0x10 LB: > { %s301_s0 = sshll.u32 %s271_s14, 3  ;;  %vm109_vm0 = vcmask 1040384   ;;  %vm111_vm1 = vcmask 1041408   ;;  %vm113_vm2 = vcmask 1042432   ;;  %vm115_vm3 = vcmask 1043456   ;;  %s22_s14 = sadd.s32 1, %s271_s14   ;;  %s271_s14 = sphi %s295_s14, %s22_s14  }
  0x11   : > { %s25_s15 = sld [smem:[#allocation3 + %s301_s0]]  ;;  %s32_s16 = sadd.s32 1, %s301_s0  ;;  %vm117_vm4 = vcmask 1044480   ;;  %vm119_vm5 = vcmask 1045504   ;;  %vm121_vm6 = vcmask 1046528   ;;  %vm125_vm7 = vcmask 261120  }
  0x12   : > { %s33_s17 = sld [smem:[#allocation3 + %s32_s16]]  ;;  %s40_s18 = sadd.s32 2, %s301_s0 }
  0x13   : > { %s41_s19 = sld [smem:[#allocation3 + %s40_s18]]  ;;  %s48_s20 = sadd.s32 3, %s301_s0 }
  0x14   : > { %s49_s21 = sld [smem:[#allocation3 + %s48_s20]]  ;;  %s56_s22 = sadd.s32 4, %s301_s0 }
  0x15   : > { %s308_s23 = sld [smem:[#allocation3 + %s56_s22]]  ;;  %s64_s24 = sadd.s32 5, %s301_s0 }
  0x16   : > { %s311_s25 = sld [smem:[#allocation3 + %s64_s24]]  ;;  %s72_s26 = sadd.s32 6, %s301_s0 }
  0x17   : > { %p26_p5 = scmp.gt.s32.totalorder %s25_s15, 0  ;;  %p159_p6 = scmp.lt.s32.totalorder %s25_s15, 999 }
  0x18   : > { %p34_p7 = scmp.gt.s32.totalorder %s33_s17, 0  ;;  %p164_p8 = scmp.lt.s32.totalorder %s33_s17, 999 }
  0x19   : > { %s367_s15 = smov (!%p26_p5, %s25_s15), 0  ;;  %p42_p9 = scmp.gt.s32.totalorder %s41_s19, 0 }
  0x1a   : > { %s369_s17 = smov (!%p34_p7, %s33_s17), 0  ;;  %s371_s15 = smov (!%p159_p6, %s367_s15), 999 }
  0x1b   : > { %s373_s17 = smov (!%p164_p8, %s369_s17), 999  ;;  %s30_s29 = scalar_lea.vmem %s364_s1, %s371_s15 }
  0x1c   : > { %s38_s4 = scalar_lea.vmem %s364_s1, %s373_s17  ;;  %p169_p10 = scmp.lt.s32.totalorder %s41_s19, 999  ;;  %v31_v3 = vld [vmem:[%s30_s29] sm:$0x1] }
  0x1d   : > { %s375_s19 = smov (!%p42_p9, %s41_s19), 0  ;;  %p50_p11 = scmp.gt.s32.totalorder %s49_s21, 0  ;;  %v39_v0 = vld [vmem:[%s38_s4] sm:$0x1] }
  0x1e   : > { %p174_p12 = scmp.lt.s32.totalorder %s49_s21, 999  ;;  %s377_s19 = smov (!%p169_p10, %s375_s19), 999  ;;  %v89_v2 = vrot.slane %v39_v0, 7 }
  0x1f   : > { %s379_s21 = smov (!%p50_p11, %s49_s21), 0  ;;  %s46_s7 = scalar_lea.vmem %s364_s1, %s377_s19 }
  0x20   : > { %p58_p13 = scmp.gt.s32.totalorder %s308_s23, 0  ;;  %s381_s21 = smov (!%p174_p12, %s379_s21), 999  ;;  %v47_v1 = vld [vmem:[%s46_s7] sm:$0x1]  ;;  %v110_v6 = vsel %vm109_vm0, %v31_v3, %v89_v2 }
  0x21   : > { %s54_s11 = scalar_lea.vmem %s364_s1, %s381_s21  ;;  %p179_p0 = scmp.lt.s32.totalorder %s308_s23, 999  ;;  %v92_v5 = vrot.slane %v47_v1, 6 }
  0x22   : > { %s59_s8 = scalar_select %p58_p13, %s308_s23, 0  ;;  %v55_v4 = vld [vmem:[%s54_s11] sm:$0x1] }
  0x23   : > { %p66_p1 = scmp.gt.s32.totalorder %s311_s25, 0  ;;  %p184_p2 = scmp.lt.s32.totalorder %s311_s25, 999  ;;  %v95_v8 = vrot.slane %v55_v4, 5  ;;  %v112_v9 = vsel %vm111_vm1, %v110_v6, %v92_v5 }
  0x24   : > { %s383_s8 = smov (!%p179_p0, %s59_s8), 999  ;;  %s73_s16 = sld [smem:[#allocation3 + %s72_s26]] }
  0x25   : > { %s385_s25 = smov (!%p66_p1, %s311_s25), 0  ;;  %s62_s15 = scalar_lea.vmem %s364_s1, %s383_s8  ;;  %v114_v12 = vsel %vm113_vm2, %v112_v9, %v95_v8 }
  0x26   : > { %s387_s25 = smov (!%p184_p2, %s385_s25), 999  ;;  %s80_s17 = sadd.s32 7, %s301_s0  ;;  %v63_v7 = vld [vmem:[%s62_s15] sm:$0x1] }
  0x27   : > { %s70_s20 = scalar_lea.vmem %s364_s1, %s387_s25  ;;  %s81_s21 = sld [smem:[#allocation3 + %s80_s17]]  ;;  %v98_v11 = vrot.slane %v63_v7, 4 }
  0x28   : > { %v71_v10 = vld [vmem:[%s70_s20] sm:$0x1]  ;;  %s124_s28 = scalar_lea.vmem [#allocation4], %s301_s0  ;;  %p19_p7 = scmp.ge.s32.totalorder %s22_s14, 2  }
  0x29   : > { %v101_v13 = vrot.slane %v71_v10, 3  ;;  %v116_v14 = vsel %vm115_vm3, %v114_v12, %v98_v11  ;;  %s274_s29 = smov (%p19_p7), [#allocation4]  }
  0x2a   : > { %p74_p3 = scmp.gt.s32.totalorder %s73_s16, 0  ;;  %p189_p4 = scmp.lt.s32.totalorder %s73_s16, 999 }
  0x2b   : > { %v118_v16 = vsel %vm117_vm4, %v116_v14, %v101_v13  ;;  %s132_s30 = sshll.u32 (%p19_p7), %s274_s29, 4  ;;  %s133_s30 = int_to_ptr.vmem [resolvable:$true] %s132_s30 }
  0x2c   : > { %s389_s16 = smov (!%p74_p3, %s73_s16), 0  ;;  %s239_s3 = scalar_lea.vmem (%p19_p7), %s133_s30, 256 }
  0x2d   : > { %p82_p5 = scmp.gt.s32.totalorder %s81_s21, 0  ;;  %p194_p6 = scmp.lt.s32.totalorder %s81_s21, 999 }
  0x2e   : > { %s391_s16 = smov (!%p189_p4, %s389_s16), 999  ;;  %p240_p8 = scmp.ne.s32.totalorder (%p19_p7), %s133_s30, %s239_s3 }
  0x2f   : > { %s393_s21 = smov (!%p82_p5, %s81_s21), 0  ;;  %s78_s24 = scalar_lea.vmem %s364_s1, %s391_s16 }
  0x30   : > { %v79_v15 = vld [vmem:[%s78_s24] sm:$0x1]  ;;  %s395_s21 = smov (!%p194_p6, %s393_s21), 999  ;;  %p244_p9 = scmp.lt.s32.totalorder (%p19_p7), %s133_s30, %s133_s30 }
  0x31   : > { %v104_v17 = vrot.slane %v79_v15, 2  ;;  %s86_s27 = scalar_lea.vmem %s364_s1, %s395_s21  ;;  %p245_p10 = scmp.lt.s32.totalorder (%p19_p7), %s239_s3, %s239_s3 }
  0x32   : > { %v87_v18 = vld [vmem:[%s86_s27] sm:$0x1]  ;;  %21 = sbr.rel (!%p19_p7) target bundleno = 16 (0x10), region = 40 }
  0x33   : > { %v120_v19 = vsel %vm119_vm5, %v118_v16, %v104_v17  ;;  %v107_v20 = vrot.slane %v87_v18, 1  ;;  %p246_p11 = por (%p19_p7), %p245_p10, %p244_p9 }
  0x35   : > { %v122_v21 = vsel %vm121_vm6, %v120_v19, %v107_v20  ;;  %p247_p12 = pnand (%p19_p7), %p246_p11, %p240_p8 }
  0x36   : > { %v123_v22 = vmul.f32 5.656854, %v122_v21 }
  0x38   : > { %126 = vst.msk [vmem:[%s124_s28] sm:$0xff] %vm125_vm7, %v123_v22 }
  0x39   :  { %250 = shalt.err (!%p247_p12)
}
  0x3a   :  { %s251_s0 = scalar_lea.hbm %s365_s2, 256 }
  0x3b   :  { %p252_p13 = scmp.ne.s32.totalorder %s365_s2, %s251_s0  ;;  %p255_p0 = scmp.lt.u32.totalorder %s251_s0, %s365_s2 }
  0x3d   :  { %p257_p1 = pnand %p255_p0, %p252_p13 }
  0x3f   :  { %260 = shalt.err (!%p257_p1)
}
  0x40   :  { %s275_s1 = smov 128   ;;  %s276_s9 = smov 8  }
  0x41   :  { %138 = dma.vmem_to_hbm [thread:$0]  %s133_s30, 256, %s365_s2, [#allocation5], %s275_s1, %s275_s1, %s276_s9  }
  0x42   :  { %267 = dma.done.wait [#allocation5], 256  }
  0x43   :  { %268 = vsyncadd [#allocation5], 4294967040 }
  0x44   :  { %142 = vsyncpa [#allocation5], 1 }

</bundles_post_ra>
